<compile_context>
chip_gen: v7x
topology: tpu7x:2x2x1
jax: 0.10.0
libtpu: 0.0.40
codegen_flags: <defaults>
</compile_context>

<pallas_src>
import functools

import numpy as np
import jax
import jax.numpy as jnp
from jax.experimental import pallas as pl
from jax.experimental.pallas import tpu as pltpu

LANE = 128            # TPU lane width; each per-query output segment pads to this
NPAD = 3 * LANE       # head columns: [logits | dup-ctr | dup-wh], each 128 wide


# ----------------------------------------------------------------------------
# Fused kernel: one grid step == one query.
#   feature matmul : [B, F] @ [F, D]      (per-query w_feat slice via BlockSpec)
#   head matmul    : [B, D] @ [D, 3*128]  (small, un-kron'ed head weights)
#   sigmoid        : stable tanh form (EUP)
#   box post-proc  : pure VPU elementwise on 128-lane-aligned segments
# ----------------------------------------------------------------------------
def _fused_kernel(x_ref, wf_ref, w_head_ref, b_head_ref, scale_ref, sscale_ref,
                  logits_ref, xyxy_ref):
    feat = jnp.dot(x_ref[...], wf_ref[0], preferred_element_type=jnp.float32)
    z = jnp.dot(feat, w_head_ref[...],
                preferred_element_type=jnp.float32) + b_head_ref[...]
    s = 0.5 * (jnp.tanh(0.5 * z) + 1.0)          # sigmoid(z), inf/NaN-free

    # All slices are whole-vreg (multiples of 128 lanes): no cross-lane
    # extraction; both stores are 128-wide unmasked lane-dense vst.
    logits_ref[...] = s[:, 0:LANE]
    # cxcywh -> xyxy with the [w,h,w,h] scaling:
    #   xyxy = [scx,scy,scx,scy]*[w,h,w,h] + [sbw,sbh,sbw,sbh]*[-w/2,-h/2,w/2,h/2]
    xyxy_ref[...] = (s[:, LANE:2 * LANE] * scale_ref[...] +
                     s[:, 2 * LANE:3 * LANE] * sscale_ref[...])


# ----------------------------------------------------------------------------
# Init-time weight re-layout (hoisted out of the per-call path).
# ----------------------------------------------------------------------------
def prepare_params(params):
    Q, D, Cc = params["num_queries"], params["hidden"], params["num_classes"]
    assert Cc <= LANE, "logit segment layout assumes num_classes <= 128"
    F = params["w_feat"].shape[0]

    # [F, Q*D] -> [Q, F, D]: the per-query column slice becomes a grid axis,
    # so the kernel never needs an in-kernel [B, Q*D] -> [B*Q, D] relayout.
    w_feat_r = jnp.transpose(params["w_feat"].reshape(F, Q, D), (1, 0, 2))

    w_logit, b_logit = params["w_logit"], params["b_logit"]     # [D,Cc],[1,Cc]
    w_box, b_box = params["w_box"], params["b_box"]             # [D,4], [1,4]

    # Small head weight [D, 3*128]:
    #   cols [0:Cc)              logits
    #   cols [128:132)           duplicated centre columns  [cx, cy, cx, cy]
    #   cols [256:260)           duplicated size columns    [bw, bh, bw, bh]
    # pad columns are zero (sigmoid(0)=0.5, sliced off in the wrapper).
    w_head = jnp.zeros((D, NPAD), jnp.float32)
    w_head = w_head.at[:, 0:Cc].set(w_logit)
    w_head = w_head.at[:, LANE:LANE + 2].set(w_box[:, 0:2])
    w_head = w_head.at[:, LANE + 2:LANE + 4].set(w_box[:, 0:2])
    w_head = w_head.at[:, 2 * LANE:2 * LANE + 2].set(w_box[:, 2:4])
    w_head = w_head.at[:, 2 * LANE + 2:2 * LANE + 4].set(w_box[:, 2:4])

    b_head = jnp.zeros((1, NPAD), jnp.float32)
    b_head = b_head.at[:, 0:Cc].set(b_logit)
    b_head = b_head.at[:, LANE:LANE + 2].set(b_box[:, 0:2])
    b_head = b_head.at[:, LANE + 2:LANE + 4].set(b_box[:, 0:2])
    b_head = b_head.at[:, 2 * LANE:2 * LANE + 2].set(b_box[:, 2:4])
    b_head = b_head.at[:, 2 * LANE + 2:2 * LANE + 4].set(b_box[:, 2:4])

    return {"w_feat_r": w_feat_r, "w_head": w_head, "b_head": b_head,
            "num_classes": Cc}


# ----------------------------------------------------------------------------
# Build the jitted forward (mirrors GroundingDino_Adaptation.forward(images,h,w)).
# Everything (h, w)-dependent is precomputed here, once.
# ----------------------------------------------------------------------------
def build_forward(prepared, h, w):
    Q, F, D = prepared["w_feat_r"].shape
    Cc = prepared["num_classes"]

    scale_np = np.zeros((1, LANE), np.float32)
    scale_np[0, 0:4] = [w, h, w, h]
    sscale_np = np.zeros((1, LANE), np.float32)
    sscale_np[0, 0:4] = [-0.5 * w, -0.5 * h, 0.5 * w, 0.5 * h]
    scale = jnp.asarray(scale_np)
    sscale = jnp.asarray(sscale_np)

    w_feat_r = prepared["w_feat_r"]
    w_head = prepared["w_head"]
    b_head = prepared["b_head"]

    @jax.jit
    def forward(images):
        B = images.shape[0]
        x_flat = images.reshape(B, -1).astype(jnp.float32)        # [B, F]

        flops = int(Q * (2 * B * F * D + 2 * B * D * NPAD))
        transcendentals = int(Q * B * NPAD)
        bytes_accessed = int(4 * (x_flat.size + w_feat_r.size + w_head.size +
                                  b_head.size + scale.size + sscale.size +
                                  2 * B * Q * LANE))

        logits_p, xyxy_p = pl.pallas_call(
            _fused_kernel,
            out_shape=(jax.ShapeDtypeStruct((B, Q * LANE), jnp.float32),
                       jax.ShapeDtypeStruct((B, Q * LANE), jnp.float32)),
            grid=(Q,),
            in_specs=[
                pl.BlockSpec((B, F), lambda q: (0, 0)),         # x: grid-resident
                pl.BlockSpec((1, F, D), lambda q: (q, 0, 0)),   # per-query w_feat
                pl.BlockSpec((D, NPAD), lambda q: (0, 0)),      # small head weight
                pl.BlockSpec((1, NPAD), lambda q: (0, 0)),      # head bias
                pl.BlockSpec((1, LANE), lambda q: (0, 0)),      # [w,h,w,h] (padded)
                pl.BlockSpec((1, LANE), lambda q: (0, 0)),      # +-[w,h]/2  (padded)
            ],
            out_specs=(pl.BlockSpec((B, LANE), lambda q: (0, q)),
                       pl.BlockSpec((B, LANE), lambda q: (0, q))),
            compiler_params=pltpu.CompilerParams(
                dimension_semantics=("parallel",)),
            cost_estimate=pl.CostEstimate(
                flops=flops, transcendentals=transcendentals,
                bytes_accessed=bytes_accessed),
        )(x_flat, w_feat_r, w_head, b_head, scale, sscale)

        logits = logits_p.reshape(B, Q, LANE)[:, :, :Cc]          # drop lane pad
        xyxy = xyxy_p.reshape(B, Q, LANE)[:, :, :4]               # drop lane pad
        return xyxy, logits

    return forward


# ----------------------------------------------------------------------------
# Pure-JAX reference (same math) for a correctness check.
# ----------------------------------------------------------------------------
def reference_forward(images, h, w, params):
    B = images.shape[0]
    Q, D, Cc = params["num_queries"], params["hidden"], params["num_classes"]
    x = images.reshape(B, -1).astype(jnp.float32)
    qf = (x @ params["w_feat"]).reshape(B, Q, D)
    logits = jax.nn.sigmoid(qf @ params["w_logit"] + params["b_logit"][0])
    box = jax.nn.sigmoid(qf @ params["w_box"] + params["b_box"][0])
    boxes = box * jnp.array([w, h, w, h], jnp.float32)
    cx, cy, bw, bh = boxes[..., 0], boxes[..., 1], boxes[..., 2], boxes[..., 3]
    xyxy = jnp.stack([cx - bw / 2, cy - bh / 2, cx + bw / 2, cy + bh / 2],
                     axis=-1)
    return xyxy, logits


if __name__ == "__main__":
    # small shapes consistent with the module's forward
    B, C, H, W = 2, 3, 16, 16         # images: [batch, 3, H, W]
    Q, D, Cc = 8, 32, 32              # num_queries, hidden, num_classes
    F = C * H * W

    key = jax.random.PRNGKey(0)
    k_img, k_feat, k_wl, k_bl, k_wb, k_bb = jax.random.split(key, 6)

    images = jax.random.normal(k_img, (B, C, H, W), jnp.float32)
    params = {
        "num_queries": Q,
        "hidden": D,
        "num_classes": Cc,
        "w_feat": 0.02 * jax.random.normal(k_feat, (F, Q * D), jnp.float32),
        "w_logit": 0.1 * jax.random.normal(k_wl, (D, Cc), jnp.float32),
        "b_logit": 0.1 * jax.random.normal(k_bl, (1, Cc), jnp.float32),
        "w_box": 0.1 * jax.random.normal(k_wb, (D, 4), jnp.float32),
        "b_box": 0.1 * jax.random.normal(k_bb, (1, 4), jnp.float32),
    }

    h_img, w_img = float(H), float(W)   # (h, w) args of forward()

    # init-time: weight re-layout + (h, w) constants hoisted out of the call path
    prepared = prepare_params(params)
    forward = build_forward(prepared, h_img, w_img)

    xyxy, logits = forward(images)
    jax.block_until_ready((xyxy, logits))

    xyxy_ref, logits_ref = reference_forward(images, h_img, w_img, params)
    assert xyxy.shape == (B, Q, 4) and logits.shape == (B, Q, Cc)
    assert jnp.allclose(xyxy, xyxy_ref, rtol=1e-4, atol=1e-4)
    assert jnp.allclose(logits, logits_ref, rtol=1e-4, atol=1e-4)

    print("KERNEL_OK")
</pallas_src>

<mosaic_0001>
module attributes {stable_mosaic.version = 11 : i64} {
  func.func @_fused_kernel(%arg0: i32, %arg1: memref<2x768xf32, #tpu.memory_space<vmem>>, %arg2: memref<1x768x32xf32, #tpu.memory_space<vmem>>, %arg3: memref<32x384xf32, #tpu.memory_space<vmem>>, %arg4: memref<1x384xf32, #tpu.memory_space<vmem>>, %arg5: memref<1x128xf32, #tpu.memory_space<vmem>>, %arg6: memref<1x128xf32, #tpu.memory_space<vmem>>, %arg7: memref<2x128xf32, #tpu.memory_space<vmem>>, %arg8: memref<2x128xf32, #tpu.memory_space<vmem>>) attributes {dimension_semantics = [#tpu.dimension_semantics<parallel>], iteration_bounds = array<i64: 8>, scalar_prefetch = 0 : i64, scratch_operands = 0 : i64, tpu.core_type = #tpu.core_type<tc>, window_params = [{pipeline_mode = #tpu.pipeline_mode<synchronous>, transform_indices = @transform_0, window_bounds = array<i64: 2, 768>}, {transform_indices = @transform_1, window_bounds = array<i64: 1, 768, 32>}, {pipeline_mode = #tpu.pipeline_mode<synchronous>, transform_indices = @transform_2, window_bounds = array<i64: 32, 384>}, {pipeline_mode = #tpu.pipeline_mode<synchronous>, transform_indices = @transform_3, window_bounds = array<i64: 1, 384>}, {pipeline_mode = #tpu.pipeline_mode<synchronous>, transform_indices = @transform_4, window_bounds = array<i64: 1, 128>}, {pipeline_mode = #tpu.pipeline_mode<synchronous>, transform_indices = @transform_5, window_bounds = array<i64: 1, 128>}, {transform_indices = @transform_6, window_bounds = array<i64: 2, 128>}, {transform_indices = @transform_7, window_bounds = array<i64: 2, 128>}]} {
    %c0 = arith.constant 0 : index
    %c0_0 = arith.constant 0 : index
    %0 = vector.load %arg1[%c0, %c0_0] : memref<2x768xf32, #tpu.memory_space<vmem>>, vector<2x768xf32>
    %c0_1 = arith.constant 0 : index
    %c0_2 = arith.constant 0 : index
    %c0_3 = arith.constant 0 : index
    %1 = vector.load %arg2[%c0_1, %c0_2, %c0_3] : memref<1x768x32xf32, #tpu.memory_space<vmem>>, vector<1x768x32xf32>
    %2 = vector.shape_cast %1 : vector<1x768x32xf32> to vector<768x32xf32>
    %cst = arith.constant dense<0.000000e+00> : vector<2x32xf32>
    %3 = tpu.matmul %0, %2, %cst {dimension_numbers = #tpu.dot_dimension_numbers<[1], [0], [0], [1], [0, 0, 1, 1], [], []>} : vector<2x768xf32>, vector<768x32xf32>, vector<2x32xf32> -> vector<2x32xf32>
    %c0_4 = arith.constant 0 : index
    %c0_5 = arith.constant 0 : index
    %4 = vector.load %arg3[%c0_4, %c0_5] : memref<32x384xf32, #tpu.memory_space<vmem>>, vector<32x384xf32>
    %cst_6 = arith.constant dense<0.000000e+00> : vector<2x384xf32>
    %5 = tpu.matmul %3, %4, %cst_6 {dimension_numbers = #tpu.dot_dimension_numbers<[1], [0], [0], [1], [0, 0, 1, 1], [], []>} : vector<2x32xf32>, vector<32x384xf32>, vector<2x384xf32> -> vector<2x384xf32>
    %c0_7 = arith.constant 0 : index
    %c0_8 = arith.constant 0 : index
    %6 = vector.load %arg4[%c0_7, %c0_8] : memref<1x384xf32, #tpu.memory_space<vmem>>, vector<1x384xf32>
    %7 = vector.broadcast %6 : vector<1x384xf32> to vector<2x384xf32>
    %8 = arith.addf %5, %7 : vector<2x384xf32>
    %cst_9 = arith.constant 5.000000e-01 : f32
    %9 = vector.broadcast %cst_9 : f32 to vector<2x384xf32>
    %10 = arith.mulf %9, %8 : vector<2x384xf32>
    %11 = math.tanh %10 : vector<2x384xf32>
    %cst_10 = arith.constant 1.000000e+00 : f32
    %12 = vector.broadcast %cst_10 : f32 to vector<2x384xf32>
    %13 = arith.addf %11, %12 : vector<2x384xf32>
    %cst_11 = arith.constant 5.000000e-01 : f32
    %14 = vector.broadcast %cst_11 : f32 to vector<2x384xf32>
    %15 = arith.mulf %14, %13 : vector<2x384xf32>
    %16 = vector.extract_strided_slice %15 {offsets = [0, 0], sizes = [2, 128], strides = [1, 1]} : vector<2x384xf32> to vector<2x128xf32>
    %c0_12 = arith.constant 0 : index
    %c0_13 = arith.constant 0 : index
    %17 = vector.load %arg7[%c0_12, %c0_13] : memref<2x128xf32, #tpu.memory_space<vmem>>, vector<2x128xf32>
    tpu.vector_store %arg7[%c0_12, %c0_13], %16 {strides = array<i32>} : memref<2x128xf32, #tpu.memory_space<vmem>>, vector<2x128xf32>,
    %18 = vector.extract_strided_slice %15 {offsets = [0, 128], sizes = [2, 128], strides = [1, 1]} : vector<2x384xf32> to vector<2x128xf32>
    %c0_14 = arith.constant 0 : index
    %c0_15 = arith.constant 0 : index
    %19 = vector.load %arg5[%c0_14, %c0_15] : memref<1x128xf32, #tpu.memory_space<vmem>>, vector<1x128xf32>
    %20 = vector.broadcast %19 : vector<1x128xf32> to vector<2x128xf32>
    %21 = arith.mulf %18, %20 : vector<2x128xf32>
    %22 = vector.extract_strided_slice %15 {offsets = [0, 256], sizes = [2, 128], strides = [1, 1]} : vector<2x384xf32> to vector<2x128xf32>
    %c0_16 = arith.constant 0 : index
    %c0_17 = arith.constant 0 : index
    %23 = vector.load %arg6[%c0_16, %c0_17] : memref<1x128xf32, #tpu.memory_space<vmem>>, vector<1x128xf32>
    %24 = vector.broadcast %23 : vector<1x128xf32> to vector<2x128xf32>
    %25 = arith.mulf %22, %24 : vector<2x128xf32>
    %26 = arith.addf %21, %25 : vector<2x128xf32>
    %c0_18 = arith.constant 0 : index
    %c0_19 = arith.constant 0 : index
    %27 = vector.load %arg8[%c0_18, %c0_19] : memref<2x128xf32, #tpu.memory_space<vmem>>, vector<2x128xf32>
    tpu.vector_store %arg8[%c0_18, %c0_19], %26 {strides = array<i32>} : memref<2x128xf32, #tpu.memory_space<vmem>>, vector<2x128xf32>,
    return
  }
  func.func @transform_0(%arg0: i32) -> (i32, i32) {
    %c0_i32 = arith.constant 0 : i32
    %c0_i32_0 = arith.constant 0 : i32
    %c0_i32_1 = arith.constant 0 : i32
    return %c0_i32, %c0_i32_0 : i32, i32
  }
  func.func @transform_1(%arg0: i32) -> (i32, i32, i32) {
    %c0_i32 = arith.constant 0 : i32
    %c0_i32_0 = arith.constant 0 : i32
    %c0_i32_1 = arith.constant 0 : i32
    return %arg0, %c0_i32, %c0_i32_0 : i32, i32, i32
  }
  func.func @transform_2(%arg0: i32) -> (i32, i32) {
    %c0_i32 = arith.constant 0 : i32
    %c0_i32_0 = arith.constant 0 : i32
    %c0_i32_1 = arith.constant 0 : i32
    return %c0_i32, %c0_i32_0 : i32, i32
  }
  func.func @transform_3(%arg0: i32) -> (i32, i32) {
    %c0_i32 = arith.constant 0 : i32
    %c0_i32_0 = arith.constant 0 : i32
    %c0_i32_1 = arith.constant 0 : i32
    return %c0_i32, %c0_i32_0 : i32, i32
  }
  func.func @transform_4(%arg0: i32) -> (i32, i32) {
    %c0_i32 = arith.constant 0 : i32
    %c0_i32_0 = arith.constant 0 : i32
    %c0_i32_1 = arith.constant 0 : i32
    return %c0_i32, %c0_i32_0 : i32, i32
  }
  func.func @transform_5(%arg0: i32) -> (i32, i32) {
    %c0_i32 = arith.constant 0 : i32
    %c0_i32_0 = arith.constant 0 : i32
    %c0_i32_1 = arith.constant 0 : i32
    return %c0_i32, %c0_i32_0 : i32, i32
  }
  func.func @transform_6(%arg0: i32) -> (i32, i32) {
    %c0_i32 = arith.constant 0 : i32
    %c0_i32_0 = arith.constant 0 : i32
    return %c0_i32, %arg0 : i32, i32
  }
  func.func @transform_7(%arg0: i32) -> (i32, i32) {
    %c0_i32 = arith.constant 0 : i32
    %c0_i32_0 = arith.constant 0 : i32
    return %c0_i32, %arg0 : i32, i32
  }
}

</mosaic_0001>

<bundles_post_ra>
// kernel: forward.1
= control target key start
LH: loop header
LB: loop body
LE: loop exit
PB: predicated region body
PF: predicated region fallthrough
CT: control target
= control target key end

     0   :  { %13 = vsyncpa [#allocation3], 0  ;;  %s1969_s0 = inlined_call_operand.vmem [shape: f32[2,768], index: 0, kind: input, shape index: {}]   ;;  %s1970_s1 = inlined_call_operand.hbm [shape: f32[8,768,32], index: 1, kind: input, shape index: {}]   ;;  %s1971_s2 = inlined_call_operand.hbm [shape: f32[32,384], index: 2, kind: input, shape index: {}]   ;;  %s1972_s3 = inlined_call_operand.hbm [shape: f32[1,384], index: 3, kind: input, shape index: {}]   ;;  %s1973_s4 = inlined_call_operand.hbm [shape: f32[1,128], index: 4, kind: input, shape index: {}]   ;;  %s1974_s5 = inlined_call_operand.hbm [shape: f32[1,128], index: 5, kind: input, shape index: {}]   ;;  %s1975_s6 = inlined_call_operand.vmem [shape: f32[2,1024], index: 6, kind: output, shape index: {0}]   ;;  %s1976_s7 = inlined_call_operand.vmem [shape: f32[2,1024], index: 7, kind: output, shape index: {1}]  }
   0x1   :  { %15 = vsyncpa [#allocation3 + $0x1], 0 }
   0x2   :  { %16 = vsyncpa [#allocation5], 0 }
   0x3   :  { %17 = vsyncpa [#allocation8], 0  ;;  %s1630_s24 = smov 0   ;;  %s1632_s25 = smov 0  }
   0x4   :  { %s1634_s26 = smov 0   ;;  %s1636_s27 = smov 0  }
   0x5 LB: > { %s1649_s28 = sadd.s32 4294967295, %s1575_s27   ;;  %p64_p0 = scmp.ne.s32.totalorder %s1567_s25, %s1563_s24  ;;  %s1575_s27 = sphi %s1636_s27, %s1994_s27   ;;  %s1571_s26 = sphi %s1634_s26, %s1993_s26   ;;  %s1567_s25 = sphi %s1632_s25, %s1992_s25   ;;  %s1563_s24 = sphi %s1630_s24, %s1991_s24  }
   0x6   : > { %p1977_p1 = scmp.eq.s32.totalorder %s1649_s28, 0  ;;  %p1041_p2 = scmp.ge.s32.totalorder %s1575_s27, 1 }
   0x7   : > { %p211_p3 = scmp.lt.s32.totalorder %s1575_s27, 9  ;;  %s1577_s8 = smov [#allocation4]  }
   0x8   : > { %p1657_p4 = por %p1977_p1, %p64_p0  ;;  %s226_s9 = sshll.u32 %s1577_s8, 4  ;;  %s1665_s9 = int_to_ptr.vmem [resolvable:$true] %s226_s9 }
   0x9   : > { %p1661_p5 = pnand %p1041_p2, %p211_p3  ;;  %s1578_s11 = smov [#allocation7]  }
   0xa   : > { %s1980_s29 = scalar_select %p1657_p4, 1, 0 }
   0xb   : > { %s1981_s30 = scalar_select %p1661_p5, 1, 0 }
   0xc   : > { %p1314_p6 = pneg %p1661_p5  ;;  %s251_s12 = sshll.u32 %s1578_s11, 4  ;;  %s1675_s12 = int_to_ptr.vmem [resolvable:$true] %s251_s12 }
   0xd   : > { %s1579_s13 = smov [#allocation6]   ;;  %s1391_s17 = scalar_lea.hbm %s1971_s2, 1536 }
   0xe   : > { %p1671_p7 = pnand %p1314_p6, %p1977_p1  ;;  %s1677_s14 = sshll.u32 %s1579_s13, 4  ;;  %s241_s14 = int_to_ptr.vmem [resolvable:$true] %s1677_s14 }
   0xf   : > { %p1392_p8 = scmp.ne.s32.totalorder %s1971_s2, %s1391_s17  ;;  %p1398_p12 = scmp.lt.u32.totalorder %s1391_s17, %s1971_s2 }
  0x10   : > { %p1687_p9 = pneg %p1671_p7 }
  0x12   : > { %p1394_p10 = pnand %p1687_p9, %p1392_p8 }
  0x14   : > { %p1395_p11 = pneg %p1394_p10 }
  0x16   : > { %p1400_p13 = pnand %p1398_p12, %p1395_p11 }
  0x18   : > { %1403 = shalt.err (!%p1400_p13)
}
  0x19   : > { %s1404_s23 = scalar_lea.vmem %s1665_s9, 1536  ;;  %p1412_p6 = scmp.lt.s32.totalorder %s1665_s9, %s1665_s9 }
  0x1a   : > { %p1405_p0 = scmp.ne.s32.totalorder %s1665_s9, %s1404_s23  ;;  %p1413_p1 = scmp.lt.s32.totalorder %s1404_s23, %s1404_s23 }
  0x1c   : > { %p1407_p2 = pnand %p1405_p0, %p1687_p9  ;;  %p1414_p8 = por %p1413_p1, %p1412_p6 }
  0x1e   : > { %p1408_p3 = pneg %p1407_p2 }
  0x20   : > { %p1415_p10 = pnand %p1414_p8, %p1408_p3 }
  0x22   : > { %1418 = shalt.err (!%p1415_p10)
}
  0x23   : > { %s1580_s24 = smov 384   ;;  %s1581_s8 = smov 24  }
  0x24   : > { %1317 = dma.hbm_to_vmem [thread:$0]  (!%p1671_p7), %s1971_s2, 1536, %s1665_s9, [#allocation5], %s1580_s24, %s1580_s24, %s1581_s8  }
  0x25   : > { %s1419_s17 = scalar_lea.hbm %s1973_s4, 16 }
  0x26   : > { %p1420_p1 = scmp.ne.s32.totalorder %s1973_s4, %s1419_s17  ;;  %p1426_p13 = scmp.lt.u32.totalorder %s1419_s17, %s1973_s4 }
  0x28   : > { %p1422_p11 = pnand %p1420_p1, %p1687_p9 }
  0x2a   : > { %p1423_p12 = pneg %p1422_p11 }
  0x2c   : > { %p1428_p0 = pnand %p1426_p13, %p1423_p12 }
  0x2e   : > { %1431 = shalt.err (!%p1428_p0)
}
  0x2f   : > { %s1432_s9 = scalar_lea.vmem %s1675_s12, 16  ;;  %s1439_s23 = scalar_lea.vmem %s1675_s12, 32 }
  0x30   : > { %p1433_p2 = scmp.ne.s32.totalorder %s1675_s12, %s1432_s9  ;;  %p1440_p8 = scmp.lt.s32.totalorder %s1675_s12, %s1675_s12 }
  0x31   : > { %p1441_p10 = scmp.lt.s32.totalorder %s1439_s23, %s1432_s9 }
  0x32   : > { %p1435_p3 = pnand %p1433_p2, %p1687_p9 }
  0x33   : > { %p1442_p1 = por %p1441_p10, %p1440_p8 }
  0x34   : > { %p1436_p6 = pneg %p1435_p3 }
  0x36   : > { %p1443_p11 = pnand %p1442_p1, %p1436_p6 }
  0x38   : > { %1446 = shalt.err (!%p1443_p11)
}
  0x39   : > { %1323 = dma.hbm_to_vmem [thread:$0]  (!%p1671_p7), %s1973_s4, 16, %s1675_s12, [#allocation8]  }
  0x3a   : > { %s1447_s15 = scalar_lea.hbm %s1972_s3, 48 }
  0x3b   : > { %p1448_p12 = scmp.ne.s32.totalorder %s1972_s3, %s1447_s15  ;;  %p1454_p2 = scmp.lt.u32.totalorder %s1447_s15, %s1972_s3 }
  0x3d   : > { %p1450_p13 = pnand %p1448_p12, %p1687_p9 }
  0x3f   : > { %p1451_p0 = pneg %p1450_p13 }
  0x41   : > { %p1456_p3 = pnand %p1454_p2, %p1451_p0 }
  0x43   : > { %1459 = shalt.err (!%p1456_p3)
}
  0x44   : > { %s1460_s21 = scalar_lea.vmem %s241_s14, 48  ;;  %s1467_s12 = scalar_lea.vmem %s241_s14, 64 }
  0x45   : > { %p1461_p6 = scmp.ne.s32.totalorder %s241_s14, %s1460_s21  ;;  %p1468_p1 = scmp.lt.s32.totalorder %s241_s14, %s241_s14 }
  0x46   : > { %p1469_p11 = scmp.lt.s32.totalorder %s1467_s12, %s1460_s21 }
  0x47   : > { %p1463_p8 = pnand %p1461_p6, %p1687_p9 }
  0x48   : > { %p1470_p4 = por %p1469_p11, %p1468_p1 }
  0x49   : > { %p1464_p10 = pneg %p1463_p8 }
  0x4b   : > { %p1471_p5 = pnand %p1470_p4, %p1464_p10 }
  0x4d   : > { %1474 = shalt.err (!%p1471_p5)
}
  0x4e   : > { %1320 = dma.hbm_to_vmem [thread:$0]  (!%p1671_p7), %s1972_s3, 48, %s241_s14, [#allocation5]  }
  0x4f   : > { %s1582_s23 = smov [#allocation9]   ;;  %s1475_s13 = scalar_lea.hbm %s1974_s5, 16 }
  0x50   : > { %s262_s24 = sshll.u32 %s1582_s23, 4  ;;  %p1476_p12 = scmp.ne.s32.totalorder %s1974_s5, %s1475_s13  ;;  %s263_s24 = int_to_ptr.vmem [resolvable:$true] %s262_s24 }
  0x51   : > { %p1482_p13 = scmp.lt.u32.totalorder %s1475_s13, %s1974_s5 }
  0x52   : > { %p1478_p4 = pnand %p1476_p12, %p1687_p9 }
  0x54   : > { %p1479_p5 = pneg %p1478_p4 }
  0x56   : > { %p1484_p0 = pnand %p1482_p13, %p1479_p5 }
  0x58   : > { %1487 = shalt.err (!%p1484_p0)
}
  0x59   : > { %s1488_s14 = scalar_lea.vmem %s263_s24, 16  ;;  %s1495_s19 = scalar_lea.vmem %s263_s24, 32 }
  0x5a   : > { %p1489_p2 = scmp.ne.s32.totalorder %s263_s24, %s1488_s14  ;;  %p1496_p8 = scmp.lt.s32.totalorder %s263_s24, %s263_s24 }
  0x5b   : > { %p1497_p10 = scmp.lt.s32.totalorder %s1495_s19, %s1488_s14 }
  0x5c   : > { %p1491_p3 = pnand %p1489_p2, %p1687_p9 }
  0x5d   : > { %p1498_p1 = por %p1497_p10, %p1496_p8 }
  0x5e   : > { %p1492_p6 = pneg %p1491_p3 }
  0x60   : > { %p1499_p11 = pnand %p1498_p1, %p1492_p6 }
  0x62   : > { %1502 = shalt.err (!%p1499_p11)
}
  0x63   : > { %1326 = dma.hbm_to_vmem [thread:$0]  (!%p1671_p7), %s1974_s5, 16, %s263_s24, [#allocation8]  }
  0x64   : > { %s1770_s20 = sadd.s32 1, %s1575_s27   ;;  %s51_s22 = sadd.s32 1, %s1571_s26 }
  0x65   : > { %s48_s9 = ssub.s32 %s1575_s27, %s1770_s20  ;;  %p58_p9 = scmp.ne.s32.totalorder %s1571_s26, %s1567_s25 }
  0x66   : > { %p49_p12 = scmp.eq.s32.totalorder %s48_s9, 0  ;;  %p59_p4 = scmp.eq.s32.totalorder %s1575_s27, 0 }
  0x67   : > { %p1335_p5 = scmp.lt.s32.totalorder %s1575_s27, 8  ;;  %s273_s10 = sand.u32 1, %s1571_s26  }
  0x68   : > { %s1781_s23 = scalar_select %p49_p12, %s1571_s26, %s51_s22  }
  0x69   : > { %p60_p13 = por %p59_p4, %p58_p9  ;;  %s1293_s8 = smul.u32 768, %s273_s10 }
  0x6a   : > { %s1294_s11 = smul.u32 12288, %s1575_s27  ;;  %s1795_s27 = scalar_lea.sflag [#allocation3], %s273_s10 }
  0x6b   : > { %p1784_p0 = pnand %p1335_p5, %p60_p13  ;;  %s277_s17 = scalar_lea.vmem [#allocation2], %s1293_s8 }
  0x6c   : > { %s1791_s16 = scalar_lea.hbm %s1970_s1, %s1294_s11  ;;  %s284_s18 = sshll.u32 %s277_s17, 4  ;;  %s1793_s18 = int_to_ptr.vmem [resolvable:$true] %s284_s18 }
  0x6d   : > { %s1503_s14 = scalar_lea.hbm %s1791_s16, 12288  ;;  %p1505_p2 = pneg %p1784_p0 }
  0x6e   : > { %p1504_p7 = scmp.ne.s32.totalorder %s1791_s16, %s1503_s14  ;;  %s1508_s12 = scalar_lea.hbm %s1970_s1, 98304 }
  0x6f   : > { %p1509_p8 = scmp.lt.u32.totalorder %s1791_s16, %s1970_s1  ;;  %p1510_p10 = scmp.lt.u32.totalorder %s1508_s12, %s1503_s14 }
  0x70   : > { %p1506_p3 = pnand %p1505_p2, %p1504_p7  ;;  %p1512_p11 = scmp.lt.u32.totalorder %s1503_s14, %s1791_s16 }
  0x71   : > { %p1511_p1 = por %p1510_p10, %p1509_p8 }
  0x72   : > { %p1507_p6 = pneg %p1506_p3 }
  0x73   : > { %p1513_p9 = por %p1512_p11, %p1511_p1 }
  0x75   : > { %p1514_p12 = pnand %p1513_p9, %p1507_p6 }
  0x77   : > { %1517 = shalt.err (!%p1514_p12)
}
  0x78   : > { %s1518_s10 = scalar_lea.vmem %s1793_s18, 12288  ;;  %s1583_s8 = smov [#allocation2]  }
  0x79   : > { %p1519_p4 = scmp.ne.s32.totalorder %s1793_s18, %s1518_s10  ;;  %s1523_s11 = sshll.u32 %s1583_s8, 4  ;;  %s1524_s11 = int_to_ptr.vmem [resolvable:$false] %s1523_s11 }
  0x7a   : > { %s1525_s24 = scalar_lea.vmem %s1524_s11, 24576  ;;  %p1526_p7 = scmp.lt.s32.totalorder %s1793_s18, %s1524_s11 }
  0x7b   : > { %p1521_p5 = pnand %p1519_p4, %p1505_p2  ;;  %p1527_p3 = scmp.lt.s32.totalorder %s1525_s24, %s1518_s10 }
  0x7d   : > { %p1522_p13 = pneg %p1521_p5  ;;  %p1528_p8 = por %p1527_p3, %p1526_p7 }
  0x7f   : > { %p1529_p10 = pnand %p1528_p8, %p1522_p13 }
  0x81   : > { %1532 = shalt.err (!%p1529_p10)
}
  0x82   : > { %s1584_s15 = smov 128   ;;  %s1585_s17 = smov 8  }
  0x83   : > { %1330 = dma.hbm_to_vmem [thread:$0]  (!%p1784_p0), %s1791_s16, 12288, %s1793_s18, %s1795_s27, %s1584_s15, %s1584_s15, %s1585_s17  }
  0x84   : > { %p1985_p2 = scmp.ne.s32.totalorder %s1981_s30, 0 }
  0x85   : > { %s298_s14 = sand.u32 (!%p1985_p2), 1, %s1567_s25   ;;  %p1986_p6 = scmp.ne.s32.totalorder (!%p1985_p2), %s1980_s29, 0 }
  0x86   : > { %296 = sbr.rel (%p1985_p2) target bundleno = 678 (0x2a6), region = 44  ;;  %s299_s21 = scalar_lea.sflag (!%p1985_p2), [#allocation3], %s298_s14 }
  0x87   : > { %s1295_s19 = smul.u32 (!%p1985_p2), 768, %s298_s14 }
  0x89   : > { %s1826_s12 = scalar_lea.vmem (!%p1985_p2), [#allocation2], %s1295_s19 }
  0x8d   : > { %1550 = dma.done.wait (%p1986_p6), %s299_s21, 12288  }
  0x8e   : > { %1552 = vsyncadd (%p1986_p6), %s299_s21, 4294955008  ;;  %p1987_p1 = scmp.eq.s32.totalorder %s1649_s28, 0 }
  0x90   : > { %1554 = dma.done.wait (%p1987_p1), [#allocation5], 1584   ;;  %p1988_p0 = pmov %p1987_p1 }
  0x92   : > { %1556 = vsyncadd (%p1988_p0), [#allocation5], 4294965712  ;;  %p1989_p11 = pmov %p1988_p0 }
  0x93   : > { %p1990_p9 = pmov %p1988_p0 }
  0x94   : > { %1558 = dma.done.wait (%p1989_p11), [#allocation8], 32  }
  0x95   : > { %1560 = vsyncadd (%p1990_p9), [#allocation8], 4294967264  ;;  %v378_v0 = vld [vmem:[%s1826_s12 + $0x80] sm:$0xff]  ;;  %v379_v1 = vld [vmem:[%s1826_s12 + $0x88] sm:$0xff]  ;;  %v1586_v47 = vmov 1983009808   ;;  %v464_v49 = vlaneseq }
  0x96   : > { %v410_v2 = vld [vmem:[%s1826_s12 + $0x180] sm:$0xff]  ;;  %v1183_v3 = vpack.c.bf16 %v379_v1, %v378_v0  ;;  %v411_v4 = vld [vmem:[%s1826_s12 + $0x188] sm:$0xff]  ;;  %v380_v11 = vld [vmem:[%s1826_s12 + $0x90] sm:$0xff]  ;;  %v462_v48 = vunpack.c.l.s4 %v1586_v47  ;;  %vm730_vm0 = vcmask 261120   ;;  %vm1589_vm1 = vmmov 0   ;;  %p352_p12 = scmp.lt.s32.totalorder %s1649_s28, 7 }
  0x97   : > { %v362_v5 = vld [vmem:[%s1826_s12] sm:$0xff]  ;;  %v363_v6 = vld [vmem:[%s1826_s12 + $0x8] sm:$0xff]  ;;  %v1215_v7 = vpack.c.bf16 %v411_v4, %v410_v2  ;;  %v381_v13 = vld [vmem:[%s1826_s12 + $0x98] sm:$0xff]  ;;  %v1882_v0 = vshrl.u32 %v464_v49, 7 }
  0x98   : > { %v1185_v8 = vpack.c.bf16 %v363_v6, %v362_v5  ;;  %v394_v9 = vld [vmem:[%s1826_s12 + $0x100] sm:$0xff]  ;;  %v395_v10 = vld [vmem:[%s1826_s12 + $0x108] sm:$0xff]  ;;  %1184 = vmatprep.subr.bf16.mxu0 %v1183_v3  ;;  %v412_v14 = vld [vmem:[%s1826_s12 + $0x190] sm:$0xff]  ;;  %v1187_v16 = vpack.c.bf16 %v381_v13, %v380_v11  ;;  %v463_v63 = vunpack.c.0.s8 %v462_v48  ;;  %s1996_s28 = smov (!%p352_p12, %s1649_s28), 7 }
  0x99   : > { %v1217_v12 = vpack.c.bf16 %v395_v10, %v394_v9  ;;  %v413_v15 = vld [vmem:[%s1826_s12 + $0x198] sm:$0xff]  ;;  %1216 = vmatprep.subr.bf16.mxu1 %v1215_v7  ;;  %v364_v18 = vld [vmem:[%s1826_s12 + $0x10] sm:$0xff]  ;;  %v382_v23 = vld [vmem:[%s1826_s12 + $0xa0] sm:$0xff]  ;;  %s1053_s18 = sshll.u32 %s1996_s28, 1 }
  0x9a   : > { %1186 = vmatpush3.bf16.msra.mxu0 %v1185_v8  ;;  %v1219_v17 = vpack.c.bf16 %v413_v15, %v412_v14  ;;  %v365_v19 = vld [vmem:[%s1826_s12 + $0x18] sm:$0xff]  ;;  %v396_v20 = vld [vmem:[%s1826_s12 + $0x110] sm:$0xff]  ;;  %v383_v24 = vld [vmem:[%s1826_s12 + $0xa8] sm:$0xff]  ;;  %v466_v13 = vsub.s32 %v463_v63, %v1882_v0  ;;  %s355_s9 = scalar_lea.vmem %s1975_s6, %s1053_s18  ;;  %s359_s8 = scalar_lea.vmem %s1976_s7, %s1053_s18 }
  0x9b   : > { %1218 = vmatpush3.bf16.msra.mxu1 %v1217_v12  ;;  %v1189_v21 = vpack.c.bf16 %v365_v19, %v364_v18  ;;  %v397_v22 = vld [vmem:[%s1826_s12 + $0x118] sm:$0xff]  ;;  %1188 = vmatprep.subr.bf16.mxu0 %v1187_v16  ;;  %v1191_v26 = vpack.c.bf16 %v383_v24, %v382_v23  ;;  %v414_v27 = vld [vmem:[%s1826_s12 + $0x1a0] sm:$0xff]  ;;  %v415_v28 = vld [vmem:[%s1826_s12 + $0x1a8] sm:$0xff] }
  0x9c   : > { %1220 = vmatprep.subr.bf16.mxu1 %v1219_v17  ;;  %v1221_v25 = vpack.c.bf16 %v397_v22, %v396_v20  ;;  %v366_v29 = vld [vmem:[%s1826_s12 + $0x20] sm:$0xff]  ;;  %v1223_v30 = vpack.c.bf16 %v415_v28, %v414_v27  ;;  %v367_v31 = vld [vmem:[%s1826_s12 + $0x28] sm:$0xff]  ;;  %v384_v35 = vld [vmem:[%s1826_s12 + $0xb0] sm:$0xff] }
  0x9d   : > { %v398_v32 = vld [vmem:[%s1826_s12 + $0x120] sm:$0xff]  ;;  %v399_v33 = vld [vmem:[%s1826_s12 + $0x128] sm:$0xff]  ;;  %v1193_v34 = vpack.c.bf16 %v367_v31, %v366_v29  ;;  %v385_v36 = vld [vmem:[%s1826_s12 + $0xb8] sm:$0xff] }
  0x9e   : > { %1190 = vmatpush3.bf16.msra.mxu0 %v1189_v21  ;;  %v416_v37 = vld [vmem:[%s1826_s12 + $0x1b0] sm:$0xff]  ;;  %v1225_v38 = vpack.c.bf16 %v399_v33, %v398_v32  ;;  %v1195_v39 = vpack.c.bf16 %v385_v36, %v384_v35  ;;  %v417_v40 = vld [vmem:[%s1826_s12 + $0x1b8] sm:$0xff]  ;;  %v386_v46 = vld [vmem:[%s1826_s12 + $0xc0] sm:$0xff] }
  0x9f   : > { %1222 = vmatpush3.bf16.msra.mxu1 %v1221_v25  ;;  %1192 = vmatprep.subr.bf16.mxu0 %v1191_v26  ;;  %v368_v41 = vld [vmem:[%s1826_s12 + $0x30] sm:$0xff]  ;;  %v369_v42 = vld [vmem:[%s1826_s12 + $0x38] sm:$0xff]  ;;  %v1227_v43 = vpack.c.bf16 %v417_v40, %v416_v37  ;;  %v387_v50 = vld [vmem:[%s1826_s12 + $0xc8] sm:$0xff] }
  0xa0   : > { %1224 = vmatprep.subr.bf16.mxu1 %v1223_v30  ;;  %v400_v44 = vld [vmem:[%s1826_s12 + $0x130] sm:$0xff]  ;;  %v401_v45 = vld [vmem:[%s1826_s12 + $0x138] sm:$0xff]  ;;  %v418_v51 = vld [vmem:[%s1826_s12 + $0x1c0] sm:$0xff]  ;;  %v1197_v53 = vpack.c.bf16 %v369_v42, %v368_v41  ;;  %v1199_v55 = vpack.c.bf16 %v387_v50, %v386_v46 }
  0xa1   : > { %v419_v52 = vld [vmem:[%s1826_s12 + $0x1c8] sm:$0xff]  ;;  %v1229_v54 = vpack.c.bf16 %v401_v45, %v400_v44  ;;  %v370_v56 = vld [vmem:[%s1826_s12 + $0x40] sm:$0xff]  ;;  %v388_v61 = vld [vmem:[%s1826_s12 + $0xd0] sm:$0xff] }
  0xa2   : > { %1194 = vmatpush3.bf16.msra.mxu0 %v1193_v34  ;;  %v371_v57 = vld [vmem:[%s1826_s12 + $0x48] sm:$0xff]  ;;  %v402_v58 = vld [vmem:[%s1826_s12 + $0x140] sm:$0xff]  ;;  %v1231_v59 = vpack.c.bf16 %v419_v52, %v418_v51  ;;  %v389_v62 = vld [vmem:[%s1826_s12 + $0xd8] sm:$0xff] }
  0xa3   : > { %1226 = vmatpush3.bf16.msra.mxu1 %v1225_v38  ;;  %1196 = vmatprep.subr.bf16.mxu0 %v1195_v39  ;;  %v403_v60 = vld [vmem:[%s1826_s12 + $0x148] sm:$0xff]  ;;  %v420_v1 = vld [vmem:[%s1826_s12 + $0x1d0] sm:$0xff]  ;;  %v421_v2 = vld [vmem:[%s1826_s12 + $0x1d8] sm:$0xff]  ;;  %v1201_v3 = vpack.c.bf16 %v371_v57, %v370_v56  ;;  %v1203_v5 = vpack.c.bf16 %v389_v62, %v388_v61 }
  0xa4   : > { %1228 = vmatprep.subr.bf16.mxu1 %v1227_v43  ;;  %v1233_v4 = vpack.c.bf16 %v403_v60, %v402_v58  ;;  %v372_v6 = vld [vmem:[%s1826_s12 + $0x50] sm:$0xff]  ;;  %v373_v7 = vld [vmem:[%s1826_s12 + $0x58] sm:$0xff]  ;;  %v1235_v9 = vpack.c.bf16 %v421_v2, %v420_v1  ;;  %v390_v11 = vld [vmem:[%s1826_s12 + $0xe0] sm:$0xff] }
  0xa5   : > { %v404_v8 = vld [vmem:[%s1826_s12 + $0x150] sm:$0xff]  ;;  %v405_v10 = vld [vmem:[%s1826_s12 + $0x158] sm:$0xff]  ;;  %v391_v12 = vld [vmem:[%s1826_s12 + $0xe8] sm:$0xff]  ;;  %v1205_v16 = vpack.c.bf16 %v373_v7, %v372_v6 }
  0xa6   : > { %1198 = vmatpush3.bf16.msra.mxu0 %v1197_v53  ;;  %v422_v14 = vld [vmem:[%s1826_s12 + $0x1e0] sm:$0xff]  ;;  %v423_v15 = vld [vmem:[%s1826_s12 + $0x1e8] sm:$0xff]  ;;  %v1237_v18 = vpack.c.bf16 %v405_v10, %v404_v8  ;;  %v1207_v19 = vpack.c.bf16 %v391_v12, %v390_v11  ;;  %v392_v25 = vld [vmem:[%s1826_s12 + $0xf0] sm:$0xff] }
  0xa7   : > { %1230 = vmatpush3.bf16.msra.mxu1 %v1229_v54  ;;  %1200 = vmatprep.subr.bf16.mxu0 %v1199_v55  ;;  %v374_v17 = vld [vmem:[%s1826_s12 + $0x60] sm:$0xff]  ;;  %v375_v20 = vld [vmem:[%s1826_s12 + $0x68] sm:$0xff]  ;;  %v1239_v23 = vpack.c.bf16 %v423_v15, %v422_v14  ;;  %v393_v26 = vld [vmem:[%s1826_s12 + $0xf8] sm:$0xff] }
  0xa8   : > { %1232 = vmatprep.subr.bf16.mxu1 %v1231_v59  ;;  %v406_v21 = vld [vmem:[%s1826_s12 + $0x160] sm:$0xff]  ;;  %v407_v24 = vld [vmem:[%s1826_s12 + $0x168] sm:$0xff]  ;;  %v424_v29 = vld [vmem:[%s1826_s12 + $0x1f0] sm:$0xff]  ;;  %v1209_v31 = vpack.c.bf16 %v375_v20, %v374_v17  ;;  %v1211_v35 = vpack.c.bf16 %v393_v26, %v392_v25 }
  0xa9   : > { %v360_v22 = vld [vmem:[%s1969_s0] sm:$0xff]  ;;  %v425_v30 = vld [vmem:[%s1826_s12 + $0x1f8] sm:$0xff]  ;;  %v1241_v34 = vpack.c.bf16 %v407_v24, %v406_v21  ;;  %v376_v36 = vld [vmem:[%s1826_s12 + $0x70] sm:$0xff] }
  0xaa   : > { %1202 = vmatpush3.bf16.msra.mxu0 %v1201_v3  ;;  %v467_v27 = vrot.slane %v360_v22, %v466_v13  ;;  %v460_v28 = vcombine.high %v360_v22, %v360_v22  ;;  %v377_v37 = vld [vmem:[%s1826_s12 + $0x78] sm:$0xff]  ;;  %v408_v38 = vld [vmem:[%s1826_s12 + $0x170] sm:$0xff]  ;;  %v1243_v39 = vpack.c.bf16 %v425_v30, %v424_v29  ;;  %v442_v42 = vld [vmem:[%s1826_s12 + $0x280] sm:$0xff] }
  0xab   : > { %1234 = vmatpush3.bf16.msra.mxu1 %v1233_v4  ;;  %1204 = vmatprep.subr.bf16.mxu0 %v1203_v5  ;;  %v409_v40 = vld [vmem:[%s1826_s12 + $0x178] sm:$0xff]  ;;  %v443_v43 = vld [vmem:[%s1826_s12 + $0x288] sm:$0xff]  ;;  %v1213_v44 = vpack.c.bf16 %v377_v37, %v376_v36  ;;  %v426_v47 = vld [vmem:[%s1826_s12 + $0x200] sm:$0xff] }
  0xac   : > { %1236 = vmatprep.subr.bf16.mxu1 %v1235_v9  ;;  %v475_v32 = vcombine.high %v467_v27, %v467_v27  ;;  %v474_v33 = vrot.slane %v460_v28, %v466_v13  ;;  %v1245_v45 = vpack.c.bf16 %v409_v40, %v408_v38  ;;  %v1247_v46 = vpack.c.bf16 %v443_v43, %v442_v42  ;;  %v427_v48 = vld [vmem:[%s1826_s12 + $0x208] sm:$0xff]  ;;  %v444_v49 = vld [vmem:[%s1826_s12 + $0x290] sm:$0xff]  ;;  %v445_v50 = vld [vmem:[%s1826_s12 + $0x298] sm:$0xff] }
  0xad   : > { %v1249_v51 = vpack.c.bf16 %v427_v48, %v426_v47  ;;  %v1055_v52 = vld.sshfl [vmem:[%s1969_s0 + $0x8] sm:$0x33 pattern:$0x76325410]  ;;  %v1251_v53 = vpack.c.bf16 %v445_v50, %v444_v49  ;;  %v428_v54 = vld [vmem:[%s1826_s12 + $0x210] sm:$0xff]  ;;  %v429_v55 = vld [vmem:[%s1826_s12 + $0x218] sm:$0xff] }
  0xae   : > { %1206 = vmatpush3.bf16.msra.mxu0 %v1205_v16  ;;  %555 = vmatprep.mubr.f32.mxu0 %v475_v32  ;;  %v476_v41 = vcombine.high %v474_v33, %v474_v33  ;;  %v484_v56 = vcombine.high %v1055_v52, %v1055_v52  ;;  %v446_v57 = vld [vmem:[%s1826_s12 + $0x2a0] sm:$0xff]  ;;  %v447_v58 = vld [vmem:[%s1826_s12 + $0x2a8] sm:$0xff]  ;;  %v1253_v59 = vpack.c.bf16 %v429_v55, %v428_v54  ;;  %v448_v63 = vld [vmem:[%s1826_s12 + $0x2b0] sm:$0xff]  ;;  %v1587_v43 = vmov 0.0  }
  0xaf   : > { %1238 = vmatpush3.bf16.msra.mxu1 %v1237_v18  ;;  %1208 = vmatprep.subr.bf16.mxu0 %v1207_v19  ;;  %v1255_v60 = vpack.c.bf16 %v447_v58, %v446_v57  ;;  %v430_v61 = vld [vmem:[%s1826_s12 + $0x220] sm:$0xff]  ;;  %v431_v62 = vld [vmem:[%s1826_s12 + $0x228] sm:$0xff]  ;;  %v449_v1 = vld [vmem:[%s1826_s12 + $0x2b8] sm:$0xff] }
  0xb0   : > { %1240 = vmatprep.subr.bf16.mxu1 %v1239_v23  ;;  %625 = vmatprep.mubr.f32.mxu1 %v476_v41  ;;  %v1257_v2 = vpack.c.bf16 %v431_v62, %v430_v61  ;;  %v1259_v3 = vpack.c.bf16 %v449_v1, %v448_v63  ;;  %v432_v4 = vld [vmem:[%s1826_s12 + $0x230] sm:$0xff]  ;;  %v433_v5 = vld [vmem:[%s1826_s12 + $0x238] sm:$0xff]  ;;  %v450_v6 = vld [vmem:[%s1826_s12 + $0x2c0] sm:$0xff]  ;;  %v717_v62 = vsub.s32 0, %v1882_v0  ;;  %v721_v1 = vsub.s32 1, %v1882_v0 }
  0xb1   : > { %v451_v7 = vld [vmem:[%s1826_s12 + $0x2c8] sm:$0xff]  ;;  %v1261_v8 = vpack.c.bf16 %v433_v5, %v432_v4  ;;  %v434_v10 = vld [vmem:[%s1826_s12 + $0x240] sm:$0xff]  ;;  %v452_v12 = vld [vmem:[%s1826_s12 + $0x2d0] sm:$0xff] }
  0xb2   : > { %1210 = vmatpush3.bf16.msra.mxu0 %v1209_v31  ;;  %v1263_v9 = vpack.c.bf16 %v451_v7, %v450_v6  ;;  %v435_v11 = vld [vmem:[%s1826_s12 + $0x248] sm:$0xff]  ;;  %v453_v13 = vld [vmem:[%s1826_s12 + $0x2d8] sm:$0xff]  ;;  %v436_v16 = vld [vmem:[%s1826_s12 + $0x250] sm:$0xff]  ;;  %v725_v7 = vsub.s32 2, %v1882_v0 }
  0xb3   : > { %1242 = vmatpush3.bf16.msra.mxu1 %v1241_v34  ;;  %1212 = vmatprep.subr.bf16.mxu0 %v1211_v35  ;;  %v1265_v14 = vpack.c.bf16 %v435_v11, %v434_v10  ;;  %v1267_v15 = vpack.c.bf16 %v453_v13, %v452_v12  ;;  %v437_v17 = vld [vmem:[%s1826_s12 + $0x258] sm:$0xff]  ;;  %v454_v18 = vld [vmem:[%s1826_s12 + $0x2e0] sm:$0xff]  ;;  %v455_v19 = vld [vmem:[%s1826_s12 + $0x2e8] sm:$0xff] }
  0xb4   : > { %1244 = vmatprep.subr.bf16.mxu1 %v1243_v39  ;;  %v1269_v20 = vpack.c.bf16 %v437_v17, %v436_v16  ;;  %v1271_v21 = vpack.c.bf16 %v455_v19, %v454_v18  ;;  %v438_v22 = vld [vmem:[%s1826_s12 + $0x260] sm:$0xff]  ;;  %v439_v23 = vld [vmem:[%s1826_s12 + $0x268] sm:$0xff]  ;;  %v456_v24 = vld [vmem:[%s1826_s12 + $0x2f0] sm:$0xff] }
  0xb5   : > { %v457_v25 = vld [vmem:[%s1826_s12 + $0x2f8] sm:$0xff]  ;;  %v1273_v26 = vpack.c.bf16 %v439_v23, %v438_v22  ;;  %v440_v28 = vld [vmem:[%s1826_s12 + $0x270] sm:$0xff]  ;;  %v702_v31 = vld [vmem:[#allocation4 + $0x8] sm:$0xff] }
  0xb6   : > { %1214 = vmatpush3.bf16.msra.mxu0 %v1213_v44  ;;  %v441_v29 = vld [vmem:[%s1826_s12 + $0x278] sm:$0xff]  ;;  %v705_v32 = vld [vmem:[#allocation4 + $0x20] sm:$0xff]  ;;  %v711_v38 = vld [vmem:[#allocation4 + $0x50] sm:$0xff]  ;;  %v1588_v44 = vmov 0.0|0.0  }
  0xb7   : > { %1246 = vmatpush3.bf16.msra.mxu1 %v1245_v45  ;;  %1248 = vmatprep.subr.bf16.mxu0 %v1247_v46  ;;  %v1277_v30 = vpack.c.bf16 %v441_v29, %v440_v28  ;;  %v1279_v34 = vpack.c.bf16 %v705_v32, %v702_v31  ;;  %v704_v35 = vld [vmem:[#allocation4 + $0x18] sm:$0xff]  ;;  %v707_v40 = vld [vmem:[#allocation4 + $0x30] sm:$0xff]  ;;  %v710_v41 = vld [vmem:[#allocation4 + $0x48] sm:$0xff] }
  0xb8   : > { %v708_v37 = vld [vmem:[#allocation4 + $0x38] sm:$0xff]  ;;  %v1285_v42 = vpack.c.bf16 %v710_v41, %v707_v40  ;;  %v706_v54 = vld [vmem:[#allocation4 + $0x28] sm:$0xff]  ;;  %v713_v63 = vld [vmem:[#allocation6] sm:$0x7] }
  0xb9   : > { %556 = vmatmul.mubr.f32.vlgmr.msra.gmra.mrb[0].mxu0 %v467_v27  ;;  %v1275_v27 = vpack.c.bf16 %v457_v25, %v456_v24  ;;  %1280 = vmatprep.subr.bf16.mxu1 %v1279_v34  ;;  %v1283_v39 = vpack.c.bf16 %v711_v38, %v708_v37  ;;  %v726_v11 = vrot.slane %v713_v63, %v725_v7  ;;  %v1058_v23 = vld [vmem:[#allocation7] ss:$0 sm:$0xff]  ;;  %v1059_v24 = vld [vmem:[#allocation9] ss:$0 sm:$0xff] }
  0xba   : > { %626 = vmatmul.mubr.f32.vlgmr.msra.gmra.mrb[0].mxu1 %v474_v33  ;;  %1250 = vmatpush3.bf16.msra.mxu0 %v1249_v51  ;;  %v701_v33 = vld [vmem:[#allocation4] sm:$0xff] }
  0xbb   : > { %1252 = vmatprep.subr.bf16.mxu0 %v1251_v53  ;;  %695 = vmatprep.mubr.f32.mxu0 %v484_v56  ;;  %v1281_v36 = vpack.c.bf16 %v704_v35, %v701_v33  ;;  %v703_v53 = vld [vmem:[#allocation4 + $0x10] sm:$0xff] }
  0xbc   : > { %798 = vmatprep.mubr.f32.mxu1 %v1587_v43  ;;  %v1288_v57 = vpack.c.bf16 %v706_v54, %v703_v53 }
  0xbd   : > { %1282 = vmatpush1.bf16.msra.mxu1 %v1281_v36 }
  0xbe   : > { %1254 = vmatpush3.bf16.msra.mxu0 %v1253_v59  ;;  %1284 = vmatprep.subr.bf16.mxu1 %v1283_v39  ;;  %v709_v59 = vld [vmem:[#allocation4 + $0x40] sm:$0xff] }
  0xbf   : > { %1256 = vmatprep.subr.bf16.mxu0 %v1255_v60  ;;  %v712_v60 = vld [vmem:[#allocation4 + $0x58] sm:$0xff] }
  0xc0   : > { %v1291_v61 = vpack.c.bf16 %v712_v60, %v709_v59 }
  0xc1   : > { %1286 = vmatpush1.bf16.msra.mxu1 %v1285_v42 }
  0xc2   : > { %1258 = vmatpush3.bf16.msra.mxu0 %v1257_v2  ;;  %1287 = vmatprep.subr.bf16.mxu1 %v1588_v44  ;;  %v718_v2 = vrot.slane %v713_v63, %v717_v62 }
  0xc3   : > { %1260 = vmatprep.subr.bf16.mxu0 %v1259_v3  ;;  %v722_v3 = vrot.slane %v713_v63, %v721_v1 }
  0xc6   : > { %1262 = vmatpush3.bf16.msra.mxu0 %v1261_v8 }
  0xc7   : > { %1264 = vmatprep.subr.bf16.mxu0 %v1263_v9 }
  0xca   : > { %1266 = vmatpush3.bf16.msra.mxu0 %v1265_v14 }
  0xcb   : > { %1268 = vmatprep.subr.bf16.mxu0 %v1267_v15 }
  0xce   : > { %1270 = vmatpush3.bf16.msra.mxu0 %v1269_v20 }
  0xcf   : > { %1272 = vmatprep.subr.bf16.mxu0 %v1271_v21 }
  0xd2   : > { %1274 = vmatpush3.bf16.msra.mxu0 %v1273_v26 }
  0xd3   : > { %1276 = vmatprep.subr.bf16.mxu0 %v1275_v27 }
  0xd6   : > { %1278 = vmatpush3.bf16.msra.mxu0 %v1277_v30 }
  0xd9   : > { %696 = vmatmul.mubr.f32.vlgmr.msra.gmra.mrb[2].mxu0 %v1055_v52 }
 0x18c   : > { %v1094_v45 = vpop.f32.mrb[0].mxu0 }
 0x18d   : > { %v1129_v46 = vpop.f32.mrb[0].mxu1  ;;  %v1095_v47 = vpop.f32.mrb[1].mxu0 }
 0x18e   : > { %v1096_v48 = vadd.f32 %v1095_v47, %v1094_v45  ;;  %v1130_v49 = vpop.f32.mrb[1].mxu1 }
 0x18f   : > { %v1131_v50 = vadd.f32 %v1130_v49, %v1129_v46 }
 0x191   : > { %v628_v51 = vadd.f32 %v1131_v50, %v1096_v48 }
 0x1ac   : > { %v1164_v52 = vpop.f32.mrb[2].mxu0 }
 0x1ad   : > { %v1165_v55 = vpop.f32.mrb[3].mxu0 }
 0x1ae   : > { %v1166_v56 = vadd.f32 %v1165_v55, %v1164_v52 }
 0x1b0   : > { %v698_v58 = vadd.f32 %v1166_v56, %v628_v51 }
 0x1b2   : > { %1056 = vmatmul.mubr.msk.f32.vlgmr.msra.gmra.mrb[2].mxu1 %vm730_vm0, %v698_v58 }
 0x1b3   : > { %1289 = vmatpush3.bf16.msra.mxu1 %v1288_v57  ;;  %1180 = vmatprep.mubr.msk.f32.mxu1 %vm1589_vm1, %v1587_v43 }
 0x1b4   : > { %1290 = vmatprep.subr.bf16.mxu1 %v1588_v44 }
 0x1b7   : > { %1292 = vmatpush3.bf16.msra.mxu1 %v1291_v61 }
 0x1ba   : > { %1181 = vmatmul.mubr.msk.f32.vlgmr.msra.gmra.mrb[4].mxu1 %vm730_vm0, %v698_v58 }
 0x285   : > { %v800_v4 = vpop.f32.mrb[2].mxu1 }
 0x286   : > { %v801_v5 = vadd.f32 %v800_v4, %v718_v2  ;;  %v802_v6 = vpop.f32.mrb[3].mxu1 }
 0x287   : > { %v803_v8 = vadd.f32 %v802_v6, %v722_v3 }
 0x288   : > { %v875_v9 = vmul.f32 0.5, %v801_v5 }
 0x289   : > { %v876_v10 = vmul.f32 0.5, %v803_v8 }
 0x28a   : > { %1385 = vtanh.f32 %v875_v9 }
 0x28b   : > { %1387 = vtanh.f32 %v876_v10 }
 0x28d   : > { %v871_v12 = vpop.f32.mrb[4].mxu1 }
 0x28e   : > { %v872_v13 = vadd.f32 %v871_v12, %v726_v11  ;;  %v1182_v14 = vpop.f32.mrb[5].mxu1 }
 0x290   : > { %v877_v15 = vmul.f32 0.5, %v872_v13 }
 0x292   : > { %1389 = vtanh.f32 %v877_v15 }
 0x294   : > { %v1386_v16 = vpop.eup %1385 }
 0x295   : > { %v881_v17 = vadd.f32 1.0, %v1386_v16  ;;  %v1388_v18 = vpop.eup %1387 }
 0x296   : > { %v882_v19 = vadd.f32 1.0, %v1388_v18 }
 0x297   : > { %v884_v0 = vmul.f32 0.5, %v881_v17 }
 0x298   : > { %v885_v21 = vmul.f32 0.5, %v882_v19 }
 0x299   : > { %887 = vst [vmem:[%s355_s9] sm:$0x3] %v884_v0 }
 0x29a   : > { %v895_v26 = vmul.f32 %v1058_v23, %v885_v21 }
 0x29c   : > { %v1390_v20 = vpop.eup %1389 }
 0x29d   : > { %v883_v22 = vadd.f32 1.0, %v1390_v20 }
 0x29f   : > { %v886_v25 = vmul.f32 0.5, %v883_v22 }
 0x2a1   : > { %v903_v27 = vmul.f32 %v1059_v24, %v886_v25 }
 0x2a3   : > { %v904_v28 = vadd.f32 %v903_v27, %v895_v26 }
 0x2a5   : > { %905 = vst [vmem:[%s359_s8] sm:$0x3] %v904_v28 }
 0x2a6 PF: > { %p20_p4 = scmp.ge.s32.totalorder %s1770_s20, 10   ;;  %s1991_s24 = smov %s1567_s25 }
 0x2a7   : > { %s1992_s25 = smov %s1571_s26  ;;  %s1993_s26 = smov %s1781_s23 }
 0x2a8   : > { %s1994_s27 = smov %s1770_s20  ;;  %22 = sbr.rel (!%p20_p4) target bundleno = 5 (0x5), region = 112 }
 0x2af   :  { %939 = vsyncpa [#allocation3], 1 }
 0x2b0   :  { %941 = vsyncpa [#allocation3 + $0x1], 1 }
 0x2b1   :  { %942 = vsyncpa [#allocation5], 1 }
 0x2b2   :  { %943 = vsyncpa [#allocation8], 1 }

</bundles_post_ra>
